<compile_context>
chip_gen: v7x
topology: tpu7x:2x2x1
jax: 0.10.0
libtpu: 0.0.40
codegen_flags: <defaults>
</compile_context>

<pallas_src>
import jax
import jax.numpy as jnp
from jax.experimental import pallas as pl
from jax.experimental.pallas import tpu as pltpu


def _round_up(x, m):
    return ((x + m - 1) // m) * m


def _sigmoid_f32(x):
    # exp + approx-reciprocal both go to the EUP slot (co-issues with MXU/VPU).
    return pl.reciprocal(1.0 + jnp.exp(-x), approx=True)


def ef_net_head_kernel(xf_ref, xm_ref, w1_ref, c1_ref, w2_ref, c2_ref,
                       wf_ref, bf_ref, out_ref, cat_ref):
    """Fused Ef_Net head (eval mode):
         meta : Linear -> BN(folded) -> Swish -> Linear -> BN(folded) -> Swish
         out  : myfc( concat([x_feat, meta(x_meta)], dim=1) )
       bf16 MXU inputs, f32 accumulation, f32 Swish.
    """
    # ---- meta branch -------------------------------------------------------
    xm = xm_ref[...]                                               # bf16 (TB, M)
    h1 = jnp.dot(xm, w1_ref[...],
                 preferred_element_type=jnp.float32) + c1_ref[...]
    h1 = h1 * _sigmoid_f32(h1)                                     # Swish, f32
    h2 = jnp.dot(h1.astype(jnp.bfloat16), w2_ref[...],
                 preferred_element_type=jnp.float32) + c2_ref[...]
    h2 = h2 * _sigmoid_f32(h2)                                     # Swish, f32

    # ---- concat via slice-stores into bf16 VMEM scratch, single final dot --
    n_feat = xf_ref.shape[1]
    cat_ref[:, :n_feat] = xf_ref[...]
    cat_ref[:, n_feat:] = h2.astype(jnp.bfloat16)

    out_ref[...] = (jnp.dot(cat_ref[...], wf_ref[...],
                            preferred_element_type=jnp.float32) + bf_ref[...])


def prepare_ef_net_params(params, num_ftrs, out_features, *, eps=1e-5):
    """One-time preprocessing: fold BatchNorm (eval) into the preceding Linear,
    pad myfc's output dim to a lane-dense 128 multiple with zero columns, and
    cast MXU weights to bf16.  Call once; reuse the result across forwards."""
    s1 = params["bn1_gamma"] / jnp.sqrt(params["bn1_var"] + eps)
    w1 = params["w1"] * s1[None, :]
    c1 = (params["b1"] - params["bn1_mean"]) * s1 + params["bn1_beta"]

    s2 = params["bn2_gamma"] / jnp.sqrt(params["bn2_var"] + eps)
    w2 = params["w2"] * s2[None, :]
    c2 = (params["b2"] - params["bn2_mean"]) * s2 + params["bn2_beta"]

    d_h2 = params["w2"].shape[1]
    n_out_pad = _round_up(max(out_features, 128), 128)
    wf = jnp.zeros((num_ftrs + d_h2, n_out_pad), jnp.float32)
    wf = wf.at[:, :out_features].set(params["wf"])
    bf = jnp.zeros((1, n_out_pad), jnp.float32)
    bf = bf.at[0, :out_features].set(params["bf"])

    return {
        "w1": w1.astype(jnp.bfloat16),
        "c1": c1[None, :].astype(jnp.float32),
        "w2": w2.astype(jnp.bfloat16),
        "c2": c2[None, :].astype(jnp.float32),
        "wf": wf.astype(jnp.bfloat16),
        "bf": bf,
        "num_ftrs": num_ftrs,
        "out_features": out_features,
        "out_pad": n_out_pad,
    }


def ef_net_forward(x_feat, x_meta, prepared, *, tile_b=128):
    """Forward of the Ef_Net head on pre-folded params (see prepare_ef_net_params)."""
    B, F = x_feat.shape
    M = x_meta.shape[1]
    assert F == prepared["num_ftrs"]
    out_features = prepared["out_features"]
    n_out = prepared["out_pad"]
    d_h1 = prepared["w1"].shape[1]
    d_h2 = prepared["w2"].shape[1]

    # Batch tile: multiple of 16 (bf16 sublane packing), capped at tile_b.
    tb = min(_round_up(B, 16), _round_up(tile_b, 16))
    padded_b = _round_up(B, tb)
    grid = (padded_b // tb,)

    # Activations: pad batch, cast to bf16 (halves DMA, hits the MXU bf16 path).
    xf = jnp.zeros((padded_b, F), jnp.bfloat16).at[:B].set(
        x_feat.astype(jnp.bfloat16))
    xm = jnp.zeros((padded_b, M), jnp.bfloat16).at[:B].set(
        x_meta.astype(jnp.bfloat16))

    def act_spec(cols):
        return pl.BlockSpec((tb, cols), lambda i: (i, 0))

    def pin_spec(shape):
        return pl.BlockSpec(shape, lambda i: (0, 0))   # VMEM-resident across grid

    flops = 2 * padded_b * (M * d_h1 + d_h1 * d_h2 + (F + d_h2) * n_out)
    bytes_accessed = (xf.size * 2 + xm.size * 2
                      + prepared["w1"].size * 2 + prepared["w2"].size * 2
                      + prepared["wf"].size * 2
                      + prepared["c1"].size * 4 + prepared["c2"].size * 4
                      + prepared["bf"].size * 4
                      + padded_b * n_out * 4)

    out = pl.pallas_call(
        ef_net_head_kernel,
        out_shape=jax.ShapeDtypeStruct((padded_b, n_out), jnp.float32),
        grid=grid,
        in_specs=[
            act_spec(F),                        # x_feat tile
            act_spec(M),                        # x_meta tile
            pin_spec((M, d_h1)),                # folded w1 (bf16)
            pin_spec((1, d_h1)),                # folded bias1 (f32)
            pin_spec((d_h1, d_h2)),             # folded w2 (bf16)
            pin_spec((1, d_h2)),                # folded bias2 (f32)
            pin_spec((F + d_h2, n_out)),        # padded myfc weight (bf16)
            pin_spec((1, n_out)),               # padded myfc bias (f32)
        ],
        out_specs=pl.BlockSpec((tb, n_out), lambda i: (i, 0)),
        scratch_shapes=[pltpu.VMEM((tb, F + d_h2), jnp.bfloat16)],
        compiler_params=pltpu.CompilerParams(
            dimension_semantics=("parallel",),        # batch rows independent
            vmem_limit_bytes=32 * 1024 * 1024),
        cost_estimate=pl.CostEstimate(
            flops=flops,
            transcendentals=padded_b * (d_h1 + d_h2),
            bytes_accessed=bytes_accessed),
    )(xf, xm, prepared["w1"], prepared["c1"], prepared["w2"], prepared["c2"],
      prepared["wf"], prepared["bf"])

    return out[:B, :out_features]


def ef_net_reference(x_feat, x_meta, params):
    """Pure-JAX f32 reference of the same forward (eval-mode PyTorch semantics)."""
    eps = 1e-5
    h = x_meta @ params["w1"] + params["b1"]
    h = (h - params["bn1_mean"]) / jnp.sqrt(params["bn1_var"] + eps) \
        * params["bn1_gamma"] + params["bn1_beta"]
    h = h * jax.nn.sigmoid(h)
    h = h @ params["w2"] + params["b2"]
    h = (h - params["bn2_mean"]) / jnp.sqrt(params["bn2_var"] + eps) \
        * params["bn2_gamma"] + params["bn2_beta"]
    h = h * jax.nn.sigmoid(h)
    cat = jnp.concatenate([x_feat, h], axis=1)
    return cat @ params["wf"] + params["bf"]


if __name__ == "__main__":
    # Small, module-consistent shapes.
    B = 4                 # batch
    NUM_FTRS = 128        # backbone feature width (arch._fc.in_features; small demo)
    N_META = 16           # n_meta_features
    H1, H2 = 512, 128     # fixed by the module's meta Sequential
    OUT_FEATURES = 8      # out_features

    key = jax.random.PRNGKey(0)
    ks = jax.random.split(key, 12)

    params = {
        "w1": jax.random.normal(ks[0], (N_META, H1), jnp.float32) * 0.05,
        "b1": jax.random.normal(ks[1], (H1,), jnp.float32) * 0.05,
        "bn1_gamma": 1.0 + 0.1 * jax.random.normal(ks[2], (H1,), jnp.float32),
        "bn1_beta": 0.1 * jax.random.normal(ks[3], (H1,), jnp.float32),
        "bn1_mean": 0.05 * jax.random.normal(ks[4], (H1,), jnp.float32),
        "bn1_var": jnp.abs(1.0 + 0.1 * jax.random.normal(ks[5], (H1,), jnp.float32)),
        "w2": jax.random.normal(ks[6], (H1, H2), jnp.float32) * 0.05,
        "b2": jax.random.normal(ks[7], (H2,), jnp.float32) * 0.05,
        "bn2_gamma": 1.0 + 0.1 * jax.random.normal(ks[8], (H2,), jnp.float32),
        "bn2_beta": 0.1 * jax.random.normal(ks[9], (H2,), jnp.float32),
        "bn2_mean": 0.05 * jax.random.normal(ks[10], (H2,), jnp.float32),
        "bn2_var": jnp.abs(1.0 + 0.1 * jax.random.normal(ks[11], (H2,), jnp.float32)),
    }
    kf = jax.random.split(jax.random.PRNGKey(1), 4)
    params["wf"] = jax.random.normal(kf[0], (NUM_FTRS + H2, OUT_FEATURES),
                                     jnp.float32) * 0.05
    params["bf"] = jax.random.normal(kf[1], (OUT_FEATURES,), jnp.float32) * 0.05

    x_feat = jax.random.normal(kf[2], (B, NUM_FTRS), jnp.float32)
    x_meta = jax.random.normal(kf[3], (B, N_META), jnp.float32)

    # One-time parameter folding / padding / bf16 cast (hoisted out of forward).
    prepared = prepare_ef_net_params(params, NUM_FTRS, OUT_FEATURES)
    prepared = jax.tree_util.tree_map(
        lambda a: jax.block_until_ready(a) if isinstance(a, jax.Array) else a,
        prepared)

    out = ef_net_forward(x_feat, x_meta, prepared)
    out = jax.block_until_ready(out)

    ref = ef_net_reference(x_feat, x_meta, params)
    assert out.shape == (B, OUT_FEATURES)
    # bf16 matmul inputs + approx reciprocal -> slightly loosened tolerance.
    assert jnp.allclose(out, ref, atol=3e-2, rtol=3e-2), "mismatch vs reference"

    print("KERNEL_OK")
</pallas_src>

<mosaic_0001>
module attributes {stable_mosaic.version = 11 : i64} {
  func.func @ef_net_head_kernel(%arg0: i32, %arg1: memref<16x128xbf16, #tpu.memory_space<vmem>>, %arg2: memref<16x16xbf16, #tpu.memory_space<vmem>>, %arg3: memref<16x512xbf16, #tpu.memory_space<vmem>>, %arg4: memref<1x512xf32, #tpu.memory_space<vmem>>, %arg5: memref<512x128xbf16, #tpu.memory_space<vmem>>, %arg6: memref<1x128xf32, #tpu.memory_space<vmem>>, %arg7: memref<256x128xbf16, #tpu.memory_space<vmem>>, %arg8: memref<1x128xf32, #tpu.memory_space<vmem>>, %arg9: memref<16x128xf32, #tpu.memory_space<vmem>>, %arg10: memref<16x256xbf16, #tpu.memory_space<vmem>>) attributes {dimension_semantics = [#tpu.dimension_semantics<parallel>], iteration_bounds = array<i64: 1>, scalar_prefetch = 0 : i64, scratch_operands = 1 : i64, tpu.core_type = #tpu.core_type<tc>, window_params = [{transform_indices = @transform_0, window_bounds = array<i64: 16, 128>}, {transform_indices = @transform_1, window_bounds = array<i64: 16, 16>}, {pipeline_mode = #tpu.pipeline_mode<synchronous>, transform_indices = @transform_2, window_bounds = array<i64: 16, 512>}, {pipeline_mode = #tpu.pipeline_mode<synchronous>, transform_indices = @transform_3, window_bounds = array<i64: 1, 512>}, {pipeline_mode = #tpu.pipeline_mode<synchronous>, transform_indices = @transform_4, window_bounds = array<i64: 512, 128>}, {pipeline_mode = #tpu.pipeline_mode<synchronous>, transform_indices = @transform_5, window_bounds = array<i64: 1, 128>}, {pipeline_mode = #tpu.pipeline_mode<synchronous>, transform_indices = @transform_6, window_bounds = array<i64: 256, 128>}, {pipeline_mode = #tpu.pipeline_mode<synchronous>, transform_indices = @transform_7, window_bounds = array<i64: 1, 128>}, {transform_indices = @transform_8, window_bounds = array<i64: 16, 128>}]} {
    %c0 = arith.constant 0 : index
    %c0_0 = arith.constant 0 : index
    %0 = vector.load %arg2[%c0, %c0_0] : memref<16x16xbf16, #tpu.memory_space<vmem>>, vector<16x16xbf16>
    %c0_1 = arith.constant 0 : index
    %c0_2 = arith.constant 0 : index
    %1 = vector.load %arg3[%c0_1, %c0_2] : memref<16x512xbf16, #tpu.memory_space<vmem>>, vector<16x512xbf16>
    %cst = arith.constant dense<0.000000e+00> : vector<16x512xf32>
    %2 = tpu.matmul %0, %1, %cst {dimension_numbers = #tpu.dot_dimension_numbers<[1], [0], [0], [1], [0, 0, 1, 1], [], []>} : vector<16x16xbf16>, vector<16x512xbf16>, vector<16x512xf32> -> vector<16x512xf32>
    %c0_3 = arith.constant 0 : index
    %c0_4 = arith.constant 0 : index
    %3 = vector.load %arg4[%c0_3, %c0_4] : memref<1x512xf32, #tpu.memory_space<vmem>>, vector<1x512xf32>
    %4 = vector.broadcast %3 : vector<1x512xf32> to vector<16x512xf32>
    %5 = arith.addf %2, %4 : vector<16x512xf32>
    %cst_5 = arith.constant 0.000000e+00 : f32
    %6 = vector.broadcast %cst_5 : f32 to vector<16x512xf32>
    %7 = arith.subf %6, %5 : vector<16x512xf32>
    %8 = math.exp %7 : vector<16x512xf32>
    %cst_6 = arith.constant 1.000000e+00 : f32
    %9 = vector.broadcast %cst_6 : f32 to vector<16x512xf32>
    %10 = arith.addf %9, %8 : vector<16x512xf32>
    %11 = tpu.reciprocal %10 {approx = true} : vector<16x512xf32> -> vector<16x512xf32>
    %12 = arith.mulf %5, %11 : vector<16x512xf32>
    %13 = arith.truncf %12 : vector<16x512xf32> to vector<16x512xbf16>
    %c0_7 = arith.constant 0 : index
    %c0_8 = arith.constant 0 : index
    %14 = vector.load %arg5[%c0_7, %c0_8] : memref<512x128xbf16, #tpu.memory_space<vmem>>, vector<512x128xbf16>
    %cst_9 = arith.constant dense<0.000000e+00> : vector<16x128xf32>
    %15 = tpu.matmul %13, %14, %cst_9 {dimension_numbers = #tpu.dot_dimension_numbers<[1], [0], [0], [1], [0, 0, 1, 1], [], []>} : vector<16x512xbf16>, vector<512x128xbf16>, vector<16x128xf32> -> vector<16x128xf32>
    %c0_10 = arith.constant 0 : index
    %c0_11 = arith.constant 0 : index
    %16 = vector.load %arg6[%c0_10, %c0_11] : memref<1x128xf32, #tpu.memory_space<vmem>>, vector<1x128xf32>
    %17 = vector.broadcast %16 : vector<1x128xf32> to vector<16x128xf32>
    %18 = arith.addf %15, %17 : vector<16x128xf32>
    %cst_12 = arith.constant 0.000000e+00 : f32
    %19 = vector.broadcast %cst_12 : f32 to vector<16x128xf32>
    %20 = arith.subf %19, %18 : vector<16x128xf32>
    %21 = math.exp %20 : vector<16x128xf32>
    %cst_13 = arith.constant 1.000000e+00 : f32
    %22 = vector.broadcast %cst_13 : f32 to vector<16x128xf32>
    %23 = arith.addf %22, %21 : vector<16x128xf32>
    %24 = tpu.reciprocal %23 {approx = true} : vector<16x128xf32> -> vector<16x128xf32>
    %25 = arith.mulf %18, %24 : vector<16x128xf32>
    %c0_14 = arith.constant 0 : index
    %c0_15 = arith.constant 0 : index
    %26 = vector.load %arg1[%c0_14, %c0_15] : memref<16x128xbf16, #tpu.memory_space<vmem>>, vector<16x128xbf16>
    %c0_16 = arith.constant 0 : index
    %c0_17 = arith.constant 0 : index
    %27 = vector.load %arg10[%c0_16, %c0_17] : memref<16x256xbf16, #tpu.memory_space<vmem>>, vector<16x128xbf16>
    tpu.vector_store %arg10[%c0_16, %c0_17], %26 {strides = array<i32>} : memref<16x256xbf16, #tpu.memory_space<vmem>>, vector<16x128xbf16>,
    %28 = arith.truncf %25 : vector<16x128xf32> to vector<16x128xbf16>
    %c0_18 = arith.constant 0 : index
    %c128 = arith.constant 128 : index
    %29 = vector.load %arg10[%c0_18, %c128] : memref<16x256xbf16, #tpu.memory_space<vmem>>, vector<16x128xbf16>
    tpu.vector_store %arg10[%c0_18, %c128], %28 {strides = array<i32>} : memref<16x256xbf16, #tpu.memory_space<vmem>>, vector<16x128xbf16>,
    %c0_19 = arith.constant 0 : index
    %c0_20 = arith.constant 0 : index
    %30 = vector.load %arg10[%c0_19, %c0_20] : memref<16x256xbf16, #tpu.memory_space<vmem>>, vector<16x256xbf16>
    %c0_21 = arith.constant 0 : index
    %c0_22 = arith.constant 0 : index
    %31 = vector.load %arg7[%c0_21, %c0_22] : memref<256x128xbf16, #tpu.memory_space<vmem>>, vector<256x128xbf16>
    %cst_23 = arith.constant dense<0.000000e+00> : vector<16x128xf32>
    %32 = tpu.matmul %30, %31, %cst_23 {dimension_numbers = #tpu.dot_dimension_numbers<[1], [0], [0], [1], [0, 0, 1, 1], [], []>} : vector<16x256xbf16>, vector<256x128xbf16>, vector<16x128xf32> -> vector<16x128xf32>
    %c0_24 = arith.constant 0 : index
    %c0_25 = arith.constant 0 : index
    %33 = vector.load %arg8[%c0_24, %c0_25] : memref<1x128xf32, #tpu.memory_space<vmem>>, vector<1x128xf32>
    %34 = vector.broadcast %33 : vector<1x128xf32> to vector<16x128xf32>
    %35 = arith.addf %32, %34 : vector<16x128xf32>
    %c0_26 = arith.constant 0 : index
    %c0_27 = arith.constant 0 : index
    %36 = vector.load %arg9[%c0_26, %c0_27] : memref<16x128xf32, #tpu.memory_space<vmem>>, vector<16x128xf32>
    tpu.vector_store %arg9[%c0_26, %c0_27], %35 {strides = array<i32>} : memref<16x128xf32, #tpu.memory_space<vmem>>, vector<16x128xf32>,
    return
  }
  func.func @transform_0(%arg0: i32) -> (i32, i32) {
    %c0_i32 = arith.constant 0 : i32
    %c0_i32_0 = arith.constant 0 : i32
    return %arg0, %c0_i32 : i32, i32
  }
  func.func @transform_1(%arg0: i32) -> (i32, i32) {
    %c0_i32 = arith.constant 0 : i32
    %c0_i32_0 = arith.constant 0 : i32
    return %arg0, %c0_i32 : i32, i32
  }
  func.func @transform_2(%arg0: i32) -> (i32, i32) {
    %c0_i32 = arith.constant 0 : i32
    %c0_i32_0 = arith.constant 0 : i32
    %c0_i32_1 = arith.constant 0 : i32
    return %c0_i32, %c0_i32_0 : i32, i32
  }
  func.func @transform_3(%arg0: i32) -> (i32, i32) {
    %c0_i32 = arith.constant 0 : i32
    %c0_i32_0 = arith.constant 0 : i32
    %c0_i32_1 = arith.constant 0 : i32
    return %c0_i32, %c0_i32_0 : i32, i32
  }
  func.func @transform_4(%arg0: i32) -> (i32, i32) {
    %c0_i32 = arith.constant 0 : i32
    %c0_i32_0 = arith.constant 0 : i32
    %c0_i32_1 = arith.constant 0 : i32
    return %c0_i32, %c0_i32_0 : i32, i32
  }
  func.func @transform_5(%arg0: i32) -> (i32, i32) {
    %c0_i32 = arith.constant 0 : i32
    %c0_i32_0 = arith.constant 0 : i32
    %c0_i32_1 = arith.constant 0 : i32
    return %c0_i32, %c0_i32_0 : i32, i32
  }
  func.func @transform_6(%arg0: i32) -> (i32, i32) {
    %c0_i32 = arith.constant 0 : i32
    %c0_i32_0 = arith.constant 0 : i32
    %c0_i32_1 = arith.constant 0 : i32
    return %c0_i32, %c0_i32_0 : i32, i32
  }
  func.func @transform_7(%arg0: i32) -> (i32, i32) {
    %c0_i32 = arith.constant 0 : i32
    %c0_i32_0 = arith.constant 0 : i32
    %c0_i32_1 = arith.constant 0 : i32
    return %c0_i32, %c0_i32_0 : i32, i32
  }
  func.func @transform_8(%arg0: i32) -> (i32, i32) {
    %c0_i32 = arith.constant 0 : i32
    %c0_i32_0 = arith.constant 0 : i32
    return %arg0, %c0_i32 : i32, i32
  }
}

</mosaic_0001>

<bundles_post_ra>
// kernel: tpu_custom_call.1
= control target key start
LH: loop header
LB: loop body
LE: loop exit
PB: predicated region body
PF: predicated region fallthrough
CT: control target
= control target key end

     0   :  { %13 = vsyncpa [#allocation4], 0  ;;  %s1415_s0 = inlined_call_operand.hbm [shape: bf16[16,128], index: 0, kind: input, shape index: {}]   ;;  %s1416_s1 = inlined_call_operand.hbm [shape: bf16[16,16], index: 1, kind: input, shape index: {}]   ;;  %s1417_s2 = inlined_call_operand.hbm [shape: bf16[16,512], index: 2, kind: input, shape index: {}]   ;;  %s1418_s3 = inlined_call_operand.vmem [shape: f32[1,512], index: 3, kind: input, shape index: {}]   ;;  %s1419_s4 = inlined_call_operand.hbm [shape: bf16[512,128], index: 4, kind: input, shape index: {}]   ;;  %s1420_s5 = inlined_call_operand.vmem [shape: f32[1,128], index: 5, kind: input, shape index: {}]   ;;  %s1421_s6 = inlined_call_operand.hbm [shape: bf16[256,128], index: 6, kind: input, shape index: {}]   ;;  %s1422_s7 = inlined_call_operand.vmem [shape: f32[1,128], index: 7, kind: input, shape index: {}]   ;;  %s1423_s8 = inlined_call_operand.hbm [shape: f32[16,128], index: 8, kind: output, shape index: {}]  }
   0x1   :  { %14 = vsyncpa [#allocation7], 0 }
   0x2   :  { %15 = vsyncpa [#allocation10], 0 }
   0x3   :  { %16 = vsyncpa [#allocation5], 0  ;;  %s1234_s27 = smov [#allocation6]   ;;  %s1235_s29 = smov [#allocation9]  }
   0x4   :  { %s34_s28 = sshll.u32 %s1234_s27, 4  ;;  %s60_s30 = sshll.u32 %s1235_s29, 4  ;;  %s35_s28 = int_to_ptr.vmem [resolvable:$true] %s34_s28  ;;  %s1292_s30 = int_to_ptr.vmem [resolvable:$true] %s60_s30 }
   0x5   :  { %s1094_s11 = scalar_lea.hbm %s1416_s1, 128 }
   0x6   :  { %p1095_p0 = scmp.ne.s32.totalorder %s1416_s1, %s1094_s11  ;;  %p1098_p1 = scmp.lt.u32.totalorder %s1094_s11, %s1416_s1 }
   0x8   :  { %p1100_p2 = pnand %p1098_p1, %p1095_p0 }
   0xa   :  { %1103 = shalt.err (!%p1100_p2)
}
   0xb   :  { %s1104_s16 = scalar_lea.vmem %s35_s28, 128  ;;  %p1109_p4 = scmp.lt.s32.totalorder %s35_s28, %s35_s28 }
   0xc   :  { %p1105_p3 = scmp.ne.s32.totalorder %s35_s28, %s1104_s16  ;;  %p1110_p5 = scmp.lt.s32.totalorder %s1104_s16, %s1104_s16 }
   0xe   :  { %p1111_p6 = por %p1110_p5, %p1109_p4 }
  0x10   :  { %p1112_p7 = pnand %p1111_p6, %p1105_p3 }
  0x12   :  { %1115 = shalt.err (!%p1112_p7)
}
  0x13   :  { %s1236_s17 = smov 64   ;;  %s1237_s18 = smov 4  }
  0x14   :  { %40 = dma.hbm_to_vmem [thread:$0]  %s1416_s1, 128, %s35_s28, [#allocation7], %s1236_s17, %s1236_s17, %s1237_s18  }
  0x15   :  { %s1116_s23 = scalar_lea.hbm %s1419_s4, 4096 }
  0x16   :  { %p1117_p8 = scmp.ne.s32.totalorder %s1419_s4, %s1116_s23  ;;  %p1120_p9 = scmp.lt.u32.totalorder %s1116_s23, %s1419_s4 }
  0x18   :  { %p1122_p10 = pnand %p1120_p9, %p1117_p8 }
  0x1a   :  { %1125 = shalt.err (!%p1122_p10)
}
  0x1b   :  { %s1126_s29 = scalar_lea.vmem %s1292_s30, 4096  ;;  %p1131_p12 = scmp.lt.s32.totalorder %s1292_s30, %s1292_s30 }
  0x1c   :  { %p1127_p11 = scmp.ne.s32.totalorder %s1292_s30, %s1126_s29  ;;  %p1132_p13 = scmp.lt.s32.totalorder %s1126_s29, %s1126_s29 }
  0x1e   :  { %p1133_p0 = por %p1132_p13, %p1131_p12 }
  0x20   :  { %p1134_p1 = pnand %p1133_p0, %p1127_p11 }
  0x22   :  { %1137 = shalt.err (!%p1134_p1)
}
  0x23   :  { %66 = dma.hbm_to_vmem [thread:$0]  %s1419_s4, 4096, %s1292_s30, [#allocation10], %s1236_s17, %s1236_s17, %s1237_s18  }
  0x24   :  { %s1238_s9 = smov [#allocation3]   ;;  %s1239_s11 = smov [#allocation8]  }
  0x25   :  { %s22_s10 = sshll.u32 %s1238_s9, 4  ;;  %s46_s12 = sshll.u32 %s1239_s11, 4  ;;  %s23_s10 = int_to_ptr.vmem [resolvable:$true] %s22_s10  ;;  %s1329_s12 = int_to_ptr.vmem [resolvable:$true] %s46_s12 }
  0x26   :  { %s1138_s15 = scalar_lea.hbm %s1415_s0, 128 }
  0x27   :  { %p1139_p2 = scmp.ne.s32.totalorder %s1415_s0, %s1138_s15  ;;  %p1142_p3 = scmp.lt.u32.totalorder %s1138_s15, %s1415_s0 }
  0x29   :  { %p1144_p4 = pnand %p1142_p3, %p1139_p2 }
  0x2b   :  { %1147 = shalt.err (!%p1144_p4)
}
  0x2c   :  { %s1148_s4 = scalar_lea.vmem %s23_s10, 128  ;;  %p1153_p6 = scmp.lt.s32.totalorder %s23_s10, %s23_s10 }
  0x2d   :  { %p1149_p5 = scmp.ne.s32.totalorder %s23_s10, %s1148_s4  ;;  %p1154_p7 = scmp.lt.s32.totalorder %s1148_s4, %s1148_s4 }
  0x2f   :  { %p1155_p8 = por %p1154_p7, %p1153_p6 }
  0x31   :  { %p1156_p9 = pnand %p1155_p8, %p1149_p5 }
  0x33   :  { %1159 = shalt.err (!%p1156_p9)
}
  0x34   :  { %28 = dma.hbm_to_vmem [thread:$0]  %s1415_s0, 128, %s23_s10, [#allocation4], %s1236_s17, %s1236_s17, %s1237_s18  }
  0x35   :  { %s1160_s25 = scalar_lea.hbm %s1417_s2, 512 }
  0x36   :  { %p1161_p10 = scmp.ne.s32.totalorder %s1417_s2, %s1160_s25  ;;  %p1164_p11 = scmp.lt.u32.totalorder %s1160_s25, %s1417_s2 }
  0x38   :  { %p1166_p12 = pnand %p1164_p11, %p1161_p10 }
  0x3a   :  { %1169 = shalt.err (!%p1166_p12)
}
  0x3b   :  { %s1170_s28 = scalar_lea.vmem %s1329_s12, 512  ;;  %p1175_p0 = scmp.lt.s32.totalorder %s1329_s12, %s1329_s12 }
  0x3c   :  { %p1171_p13 = scmp.ne.s32.totalorder %s1329_s12, %s1170_s28  ;;  %p1176_p1 = scmp.lt.s32.totalorder %s1170_s28, %s1170_s28 }
  0x3e   :  { %p1177_p2 = por %p1176_p1, %p1175_p0 }
  0x40   :  { %p1178_p3 = pnand %p1177_p2, %p1171_p13 }
  0x42   :  { %1181 = shalt.err (!%p1178_p3)
}
  0x43   :  { %s1240_s0 = smov 256   ;;  %s1241_s9 = smov 16  }
  0x44   :  { %52 = dma.hbm_to_vmem [thread:$0]  %s1417_s2, 512, %s1329_s12, [#allocation7], %s1240_s0, %s1240_s0, %s1241_s9  }
  0x45   :  { %s1242_s13 = smov [#allocation11]   ;;  %s1182_s19 = scalar_lea.hbm %s1421_s6, 2048 }
  0x46   :  { %s74_s14 = sshll.u32 %s1242_s13, 4  ;;  %p1183_p4 = scmp.ne.s32.totalorder %s1421_s6, %s1182_s19  ;;  %s75_s14 = int_to_ptr.vmem [resolvable:$true] %s74_s14 }
  0x47   :  { %p1186_p5 = scmp.lt.u32.totalorder %s1182_s19, %s1421_s6 }
  0x49   :  { %p1188_p6 = pnand %p1186_p5, %p1183_p4 }
  0x4b   :  { %1191 = shalt.err (!%p1188_p6)
}
  0x4c   :  { %s1192_s22 = scalar_lea.vmem %s75_s14, 2048  ;;  %p1197_p8 = scmp.lt.s32.totalorder %s75_s14, %s75_s14 }
  0x4d   :  { %p1193_p7 = scmp.ne.s32.totalorder %s75_s14, %s1192_s22  ;;  %p1198_p9 = scmp.lt.s32.totalorder %s1192_s22, %s1192_s22 }
  0x4f   :  { %p1199_p10 = por %p1198_p9, %p1197_p8 }
  0x51   :  { %p1200_p11 = pnand %p1199_p10, %p1193_p7 }
  0x53   :  { %1203 = shalt.err (!%p1200_p11)
}
  0x54   :  { %80 = dma.hbm_to_vmem [thread:$0]  %s1421_s6, 2048, %s75_s14, [#allocation10], %s1236_s17, %s1236_s17, %s1237_s18  }
  0x55   :  { %1226 = dma.done.wait [#allocation4], 128  }
  0x56   :  { %1227 = vsyncadd [#allocation4], 4294967168 }
  0x57   :  { %1228 = dma.done.wait [#allocation7], 640  }
  0x58   :  { %1229 = vsyncadd [#allocation7], 4294966656 }
  0x59   :  { %1230 = dma.done.wait [#allocation10], 6144  }
  0x5a   :  { %1231 = vsyncadd [#allocation10], 4294961152  ;;  %v1243_v0 = vmov 0   ;;  %v998_v1 = vld [vmem:[#allocation8 + $0x4] ss:$16 sps:$4 sm:$0xff]   ;;  %v1001_v3 = vld [vmem:[#allocation6] sm:$0xff]   ;;  %v107_v38 = vlaneseq }
  0x5b   :  { %188 = vmatprep.mubr.bf16.mxu1 %v1243_v0  ;;  %v1000_v2 = vld [vmem:[#allocation8] ss:$16 sps:$4 sm:$0xff]   ;;  %156 = vmatprep.subr.bf16.mxu1 %v998_v1  ;;  %vm152_vm0 = vcmask 130048   ;;  %v1002_v4 = vld [vmem:[#allocation8 + $0x8] ss:$16 sps:$4 sm:$0xff]   ;;  %s1244_s24 = smov [#allocation12]  }
  0x5c   :  { %157 = vmatpush1.bf16.msra.mxu1 %v1000_v2  ;;  %v1004_v5 = vld [vmem:[#allocation8 + $0xc] ss:$16 sps:$4 sm:$0xff]   ;;  %v1005_v6 = vld [vmem:[#allocation9 + $0x40] sm:$0xff]   ;;  %v1009_v10 = vld [vmem:[#allocation9 + $0x50] sm:$0xff]   ;;  %v108_v39 = vshrl.u32 %v107_v38, 7  ;;  %s847_s25 = sshll.u32 %s1244_s24, 4  ;;  %s848_s25 = int_to_ptr.vmem [resolvable:$true] %s847_s25 }
  0x5d   :  { %199 = vmatprep.subr.bf16.mxu1 %v1004_v5  ;;  %v1006_v7 = vld [vmem:[#allocation9] sm:$0xff]   ;;  %919 = vmatprep.subr.bf16.mxu0 %v1005_v6  ;;  %v1007_v8 = vld [vmem:[#allocation9 + $0x48] sm:$0xff]   ;;  %v1011_v12 = vld [vmem:[#allocation9 + $0x10] sm:$0xff]   ;;  %s1204_s26 = scalar_lea.vmem %s848_s25, 256  ;;  %p1209_p13 = scmp.lt.s32.totalorder %s848_s25, %s848_s25 }
  0x5e   :  { %920 = vmatpush3.bf16.msra.mxu0 %v1006_v7  ;;  %v1008_v9 = vld [vmem:[#allocation9 + $0x8] sm:$0xff]   ;;  %v1010_v11 = vld [vmem:[#allocation9 + $0xc0] sm:$0xff]   ;;  %v1013_v14 = vld [vmem:[#allocation9 + $0x58] sm:$0xff]   ;;  %v109_v40 = vsub.s32 0, %v108_v39  ;;  %v113_v42 = vsub.s32 1, %v108_v39  ;;  %v117_v48 = vsub.s32 2, %v108_v39  ;;  %p1205_p12 = scmp.ne.s32.totalorder %s848_s25, %s1204_s26  ;;  %p1210_p0 = scmp.lt.s32.totalorder %s1204_s26, %s1204_s26 }
  0x5f   :  { %866 = vmatmul.mubr.msk.bf16.vlgmr.msra.gmra.mrb[0].mxu1 %vm152_vm0, %v1001_v3  ;;  %921 = vmatprep.subr.bf16.mxu0 %v1007_v8  ;;  %v1012_v13 = vld [vmem:[#allocation9 + $0x80] sm:$0xff]   ;;  %v1014_v15 = vld [vmem:[#allocation9 + $0xc8] sm:$0xff]   ;;  %v1015_v16 = vld [vmem:[#allocation9 + $0x18] sm:$0xff]   ;;  %v121_v51 = vsub.s32 3, %v108_v39 }
  0x60   :  { %200 = vmatpush1.bf16.msra.mxu1 %v1002_v4  ;;  %231 = vmatprep.mubr.bf16.mxu1 %v1243_v0  ;;  %v1016_v17 = vld [vmem:[#allocation9 + $0x88] sm:$0xff]   ;;  %v1017_v18 = vld [vmem:[#allocation9 + $0x60] sm:$0xff]   ;;  %v1018_v19 = vld [vmem:[#allocation9 + $0xd0] sm:$0xff]   ;;  %p1211_p1 = por %p1210_p0, %p1209_p13 }
  0x61   :  { %941 = vmatprep.subr.bf16.mxu1 %v1010_v11  ;;  %v1019_v20 = vld [vmem:[#allocation9 + $0x20] sm:$0xff]   ;;  %v1020_v21 = vld [vmem:[#allocation9 + $0x90] sm:$0xff]   ;;  %v1021_v22 = vld [vmem:[#allocation9 + $0x68] sm:$0xff]  }
  0x62   :  { %922 = vmatpush3.bf16.msra.mxu0 %v1008_v9  ;;  %v1022_v23 = vld [vmem:[#allocation9 + $0xd8] sm:$0xff]   ;;  %v1023_v24 = vld [vmem:[#allocation9 + $0x28] sm:$0xff]   ;;  %v1025_v26 = vld [vmem:[#allocation9 + $0x70] sm:$0xff]   ;;  %p1212_p2 = pnand %p1211_p1, %p1205_p12 }
  0x63   :  { %923 = vmatprep.subr.bf16.mxu0 %v1009_v10  ;;  %v1024_v25 = vld [vmem:[#allocation9 + $0x98] sm:$0xff]   ;;  %v1026_v27 = vld [vmem:[#allocation9 + $0xe0] sm:$0xff]   ;;  %v1027_v28 = vld [vmem:[#allocation9 + $0x30] sm:$0xff]  }
  0x64   :  { %v1028_v29 = vld [vmem:[#allocation9 + $0xa0] sm:$0xff]   ;;  %v1029_v30 = vld [vmem:[#allocation9 + $0x78] sm:$0xff]   ;;  %v1030_v31 = vld [vmem:[#allocation9 + $0xe8] sm:$0xff]  }
  0x65   :  { %v1031_v32 = vld [vmem:[#allocation9 + $0x38] sm:$0xff]   ;;  %v1032_v33 = vld [vmem:[#allocation9 + $0xa8] sm:$0xff]   ;;  %v1033_v34 = vld [vmem:[#allocation9 + $0xf0] sm:$0xff]  }
  0x66   :  { %924 = vmatpush3.bf16.msra.mxu0 %v1011_v12  ;;  %v1034_v35 = vld [vmem:[#allocation9 + $0xb0] sm:$0xff]   ;;  %v1035_v36 = vld [vmem:[#allocation9 + $0xf8] sm:$0xff]  }
  0x67   :  { %867 = vmatmul.mubr.msk.bf16.vlgmr.msra.gmra.mrb[4].mxu1 %vm152_vm0, %v1001_v3  ;;  %925 = vmatprep.subr.bf16.mxu0 %v1013_v14  ;;  %v1036_v37 = vld [vmem:[#allocation9 + $0xb8] sm:$0xff]   ;;  %v105_v41 = vld [vmem:[%s1418_s3] sm:$0xf] }
  0x68   :  { %942 = vmatpush3.bf16.msra.mxu1 %v1012_v13  ;;  %v110_v43 = vrot.slane %v105_v41, %v109_v40  ;;  %v114_v44 = vrot.slane %v105_v41, %v113_v42  ;;  %v118_v59 = vrot.slane %v105_v41, %v117_v48  ;;  %v122_v62 = vrot.slane %v105_v41, %v121_v51 }
  0x69   :  { %943 = vmatprep.subr.bf16.mxu1 %v1014_v15 }
  0x6a   :  { %926 = vmatpush3.bf16.msra.mxu0 %v1015_v16 }
  0x6b   :  { %927 = vmatprep.subr.bf16.mxu0 %v1017_v18 }
  0x6c   :  { %944 = vmatpush3.bf16.msra.mxu1 %v1016_v17 }
  0x6d   :  { %945 = vmatprep.subr.bf16.mxu1 %v1018_v19 }
  0x6e   :  { %928 = vmatpush3.bf16.msra.mxu0 %v1019_v20 }
  0x6f   :  { %929 = vmatprep.subr.bf16.mxu0 %v1021_v22 }
  0x70   :  { %946 = vmatpush3.bf16.msra.mxu1 %v1020_v21 }
  0x71   :  { %947 = vmatprep.subr.bf16.mxu1 %v1022_v23 }
  0x72   :  { %930 = vmatpush3.bf16.msra.mxu0 %v1023_v24 }
  0x73   :  { %931 = vmatprep.subr.bf16.mxu0 %v1025_v26 }
  0x74   :  { %948 = vmatpush3.bf16.msra.mxu1 %v1024_v25 }
  0x75   :  { %949 = vmatprep.subr.bf16.mxu1 %v1026_v27 }
  0x76   :  { %932 = vmatpush3.bf16.msra.mxu0 %v1027_v28 }
  0x77   :  { %933 = vmatprep.subr.bf16.mxu0 %v1029_v30 }
  0x78   :  { %950 = vmatpush3.bf16.msra.mxu1 %v1028_v29 }
  0x79   :  { %951 = vmatprep.subr.bf16.mxu1 %v1030_v31 }
  0x7a   :  { %934 = vmatpush3.bf16.msra.mxu0 %v1031_v32 }
  0x7c   :  { %952 = vmatpush3.bf16.msra.mxu1 %v1032_v33 }
  0x7d   :  { %953 = vmatprep.subr.bf16.mxu1 %v1033_v34 }
  0x80   :  { %954 = vmatpush3.bf16.msra.mxu1 %v1034_v35 }
  0x81   :  { %955 = vmatprep.subr.bf16.mxu1 %v1035_v36 }
  0x84   :  { %956 = vmatpush3.bf16.msra.mxu1 %v1036_v37 }
 0x132   :  { %v190_v45 = vpop.f32.mrb[0].mxu1 }
 0x133   :  { %v1381_v46 = vadd.f32 %v190_v45, %v110_v43  ;;  %v192_v47 = vpop.f32.mrb[1].mxu1 }
 0x134   :  { %v1383_v49 = vadd.f32 %v192_v47, %v114_v44  ;;  %v194_v50 = vpop.f32.mrb[2].mxu1 }
 0x135   :  { %v242_v52 = vsub.f32 0.0, %v1381_v46  ;;  %v1386_v53 = vadd.f32 %v194_v50, %v110_v43  ;;  %v196_v54 = vpop.f32.mrb[3].mxu1 }
 0x136   :  { %v243_v55 = vsub.f32 0.0, %v1383_v49  ;;  %v1389_v56 = vadd.f32 %v196_v54, %v114_v44 }
 0x137   :  { %v250_v57 = vmul.f32 1.442695, %v242_v52  ;;  %v246_v58 = vsub.f32 0.0, %v1386_v53 }
 0x138   :  { %v252_v60 = vmul.f32 1.442695, %v243_v55  ;;  %v247_v61 = vsub.f32 0.0, %v1389_v56  ;;  %v1039_v55 = vld [vmem:[#allocation11 + $0x48] sm:$0xff]  }
 0x139   :  { %1054 = vpow2.f32 %v250_v57  ;;  %v258_v63 = vmul.f32 1.442695, %v246_v58  ;;  %v1041_v57 = vld [vmem:[#allocation11 + $0x50] sm:$0xff]  }
 0x13a   :  { %1056 = vpow2.f32 %v252_v60  ;;  %v260_v0 = vmul.f32 1.442695, %v247_v61  ;;  %v233_v1 = vpop.f32.mrb[4].mxu1  ;;  %v1042_v58 = vld [vmem:[#allocation11 + $0x10] sm:$0xff]   ;;  %v1044_v60 = vld [vmem:[#allocation11 + $0x18] sm:$0xff]   ;;  %v1045_v61 = vld [vmem:[#allocation11 + $0x60] sm:$0xff]  }
 0x13b   :  { %1058 = vpow2.f32 %v258_v63  ;;  %v234_v2 = vadd.f32 %v233_v1, %v118_v59  ;;  %v235_v3 = vpop.f32.mrb[5].mxu1  ;;  %v1047_v63 = vld [vmem:[#allocation11 + $0x68] sm:$0xff]   ;;  %v1049_v1 = vld [vmem:[#allocation11 + $0x70] sm:$0xff]  }
 0x13c   :  { %1060 = vpow2.f32 %v260_v0  ;;  %v236_v4 = vadd.f32 %v235_v3, %v122_v62  ;;  %v237_v5 = vpop.f32.mrb[6].mxu1  ;;  %v1048_v0 = vld [vmem:[#allocation11 + $0x28] sm:$0xff]   ;;  %v1051_v3 = vld [vmem:[#allocation11 + $0x78] sm:$0xff]  }
 0x13d   :  { %v244_v6 = vsub.f32 0.0, %v234_v2  ;;  %v238_v7 = vadd.f32 %v237_v5, %v118_v59  ;;  %v239_v8 = vpop.f32.mrb[7].mxu1  ;;  %v1043_v59 = vld [vmem:[#allocation11 + $0x58] sm:$0xff]  }
 0x13e   :  { %v245_v9 = vsub.f32 0.0, %v236_v4  ;;  %v240_v10 = vadd.f32 %v239_v8, %v122_v62  ;;  %v1046_v62 = vld [vmem:[#allocation11 + $0x20] sm:$0xff]  }
 0x13f   :  { %v254_v11 = vmul.f32 1.442695, %v244_v6  ;;  %v248_v12 = vsub.f32 0.0, %v238_v7 }
 0x140   :  { %v256_v13 = vmul.f32 1.442695, %v245_v9  ;;  %v249_v14 = vsub.f32 0.0, %v240_v10 }
 0x141   :  { %1062 = vpow2.f32 %v254_v11  ;;  %v262_v15 = vmul.f32 1.442695, %v248_v12  ;;  %v868_v11 = vld [vmem:[%s1420_s5] ss:$0 sm:$0xff] }
 0x142   :  { %1064 = vpow2.f32 %v256_v13  ;;  %v264_v16 = vmul.f32 1.442695, %v249_v14 }
 0x143   :  { %v1055_v17 = vpop.eup %1054  ;;  %1066 = vpow2.f32 %v262_v15 }
 0x144   :  { %v1057_v18 = vpop.eup %1056  ;;  %v266_v19 = vadd.f32 1.0, %v1055_v17  ;;  %1068 = vpow2.f32 %v264_v16 }
 0x145   :  { %v1059_v20 = vpop.eup %1058  ;;  %v267_v21 = vadd.f32 1.0, %v1057_v18 }
 0x146   :  { %v1061_v22 = vpop.eup %1060  ;;  %1070 = vrcp.f32 %v266_v19  ;;  %v270_v23 = vadd.f32 1.0, %v1059_v20 }
 0x147   :  { %1072 = vrcp.f32 %v267_v21  ;;  %v271_v24 = vadd.f32 1.0, %v1061_v22 }
 0x148   :  { %1074 = vrcp.f32 %v270_v23 }
 0x149   :  { %1076 = vrcp.f32 %v271_v24 }
 0x14b   :  { %v1063_v25 = vpop.eup %1062 }
 0x14c   :  { %v1065_v26 = vpop.eup %1064  ;;  %v268_v27 = vadd.f32 1.0, %v1063_v25 }
 0x14d   :  { %v1067_v28 = vpop.eup %1066  ;;  %v269_v29 = vadd.f32 1.0, %v1065_v26 }
 0x14e   :  { %v1069_v30 = vpop.eup %1068  ;;  %1078 = vrcp.f32 %v268_v27  ;;  %v272_v31 = vadd.f32 1.0, %v1067_v28 }
 0x14f   :  { %1080 = vrcp.f32 %v269_v29  ;;  %v273_v32 = vadd.f32 1.0, %v1069_v30 }
 0x150   :  { %v1071_v33 = vpop.eup %1070  ;;  %1082 = vrcp.f32 %v272_v31 }
 0x151   :  { %v1073_v34 = vpop.eup %1072  ;;  %1084 = vrcp.f32 %v273_v32  ;;  %v282_v37 = vmul.f32 %v1071_v33, %v1381_v46 }
 0x152   :  { %v1075_v35 = vpop.eup %1074  ;;  %v283_v39 = vmul.f32 %v1073_v34, %v1383_v49  ;;  %v1038_v49 = vld [vmem:[#allocation11] sm:$0xff]   ;;  %v1053_v34 = vld [vmem:[#allocation3] sm:$0xff]  }
 0x153   :  { %v1077_v36 = vpop.eup %1076  ;;  %v286_v38 = vmul.f32 %v1075_v35, %v1386_v53  ;;  %v1037_v53 = vld [vmem:[#allocation11 + $0x40] sm:$0xff]  }
 0x154   :  { %v287_v40 = vmul.f32 %v1077_v36, %v1389_v56  ;;  %963 = vmatprep.subr.bf16.mxu0 %v1037_v53  ;;  %v1040_v56 = vld [vmem:[#allocation11 + $0x8] sm:$0xff]  }
 0x155   :  { %v290_v41 = vpack.c.bf16 %v286_v38, %v282_v37  ;;  %v902_v37 = vld [vmem:[%s1422_s7] ss:$0 sm:$0xff] }
 0x156   :  { %v291_v42 = vpack.c.bf16 %v287_v40, %v283_v39 }
 0x158   :  { %v1079_v43 = vpop.eup %1078  ;;  %589 = vmatprep.mubr.bf16.mxu0 %v291_v42 }
 0x159   :  { %v1081_v44 = vpop.eup %1080  ;;  %590 = vmatmul.mubr.bf16.vlgmr.msra.gmra.mrb[0].mxu0 %v290_v41  ;;  %v284_v48 = vmul.f32 %v1079_v43, %v234_v2  ;;  %v1050_v2 = vld [vmem:[#allocation11 + $0x30] sm:$0xff]  }
 0x15a   :  { %v1083_v45 = vpop.eup %1082  ;;  %v285_v51 = vmul.f32 %v1081_v44, %v236_v4  ;;  %964 = vmatpush3.bf16.msra.mxu0 %v1038_v49  ;;  %v1052_v4 = vld [vmem:[#allocation11 + $0x38] sm:$0xff]  }
 0x15b   :  { %v1085_v47 = vpop.eup %1084  ;;  %v288_v50 = vmul.f32 %v1083_v45, %v238_v7  ;;  %965 = vmatprep.subr.bf16.mxu0 %v1039_v55 }
 0x15c   :  { %v289_v52 = vmul.f32 %v1085_v47, %v240_v10 }
 0x15d   :  { %v292_v54 = vpack.c.bf16 %v288_v50, %v284_v48 }
 0x15e   :  { %v293_v46 = vpack.c.bf16 %v289_v52, %v285_v51  ;;  %966 = vmatpush3.bf16.msra.mxu0 %v1040_v56 }
 0x15f   :  { %967 = vmatprep.subr.bf16.mxu0 %v1041_v57 }
 0x160   :  { %630 = vmatprep.mubr.bf16.mxu1 %v293_v46 }
 0x161   :  { %631 = vmatmul.mubr.bf16.vlgmr.msra.gmra.mrb[8].mxu1 %v292_v54 }
 0x162   :  { %968 = vmatpush3.bf16.msra.mxu0 %v1042_v58 }
 0x163   :  { %969 = vmatprep.subr.bf16.mxu0 %v1043_v59 }
 0x166   :  { %970 = vmatpush3.bf16.msra.mxu0 %v1044_v60 }
 0x167   :  { %971 = vmatprep.subr.bf16.mxu0 %v1045_v61 }
 0x16a   :  { %972 = vmatpush3.bf16.msra.mxu0 %v1046_v62 }
 0x16b   :  { %973 = vmatprep.subr.bf16.mxu0 %v1047_v63 }
 0x16e   :  { %974 = vmatpush3.bf16.msra.mxu0 %v1048_v0 }
 0x16f   :  { %975 = vmatprep.subr.bf16.mxu0 %v1049_v1 }
 0x172   :  { %976 = vmatpush3.bf16.msra.mxu0 %v1050_v2 }
 0x173   :  { %977 = vmatprep.subr.bf16.mxu0 %v1051_v3 }
 0x176   :  { %978 = vmatpush3.bf16.msra.mxu0 %v1052_v4 }
 0x22c   :  { %v935_v5 = vpop.f32.mrb[0].mxu0 }
 0x22d   :  { %v936_v6 = vpop.f32.mrb[1].mxu0 }
 0x22e   :  { %v937_v7 = vadd.f32 %v936_v6, %v935_v5  ;;  %v938_v8 = vpop.f32.mrb[2].mxu0 }
 0x22f   :  { %v939_v9 = vpop.f32.mrb[3].mxu0 }
 0x230   :  { %v940_v10 = vadd.f32 %v939_v9, %v938_v8  ;;  %v592_v14 = vadd.f32 %v937_v7, %v868_v11 }
 0x232   :  { %v595_v18 = vadd.f32 %v940_v10, %v868_v11 }
 0x234   :  { %v957_v12 = vpop.f32.mrb[8].mxu1 }
 0x235   :  { %v958_v13 = vpop.f32.mrb[9].mxu1 }
 0x236   :  { %v959_v15 = vadd.f32 %v958_v13, %v957_v12  ;;  %v960_v16 = vpop.f32.mrb[10].mxu1 }
 0x237   :  { %v961_v17 = vpop.f32.mrb[11].mxu1 }
 0x238   :  { %v633_v19 = vadd.f32 %v959_v15, %v592_v14  ;;  %v962_v20 = vadd.f32 %v961_v17, %v960_v16 }
 0x23a   :  { %v639_v21 = vsub.f32 0.0, %v633_v19  ;;  %v636_v22 = vadd.f32 %v962_v20, %v595_v18 }
 0x23c   :  { %v641_v23 = vmul.f32 1.442695, %v639_v21  ;;  %v640_v24 = vsub.f32 0.0, %v636_v22 }
 0x23e   :  { %1086 = vpow2.f32 %v641_v23  ;;  %v643_v25 = vmul.f32 1.442695, %v640_v24 }
 0x240   :  { %1088 = vpow2.f32 %v643_v25 }
 0x248   :  { %v1087_v26 = vpop.eup %1086 }
 0x249   :  { %v645_v27 = vadd.f32 1.0, %v1087_v26 }
 0x24a   :  { %v1089_v28 = vpop.eup %1088 }
 0x24b   :  { %1090 = vrcp.f32 %v645_v27  ;;  %v646_v29 = vadd.f32 1.0, %v1089_v28 }
 0x24d   :  { %1092 = vrcp.f32 %v646_v29 }
 0x255   :  { %v1091_v30 = vpop.eup %1090 }
 0x256   :  { %v649_v32 = vmul.f32 %v1091_v30, %v633_v19 }
 0x257   :  { %v1093_v31 = vpop.eup %1092 }
 0x258   :  { %v650_v33 = vmul.f32 %v1093_v31, %v636_v22 }
 0x25a   :  { %v660_v35 = vpack.c.bf16 %v650_v33, %v649_v32 }
 0x25c   :  { %831 = vmatprep.mubr.bf16.mxu0 %v660_v35 }
 0x25d   :  { %832 = vmatmul.mubr.bf16.vlgmr.msra.gmra.mrb[4].mxu0 %v1053_v34 }
 0x330   :  { %v979_v36 = vpop.f32.mrb[4].mxu0 }
 0x331   :  { %v980_v38 = vpop.f32.mrb[5].mxu0 }
 0x332   :  { %v981_v39 = vadd.f32 %v980_v38, %v979_v36  ;;  %v982_v40 = vpop.f32.mrb[6].mxu0 }
 0x333   :  { %v983_v41 = vpop.f32.mrb[7].mxu0 }
 0x334   :  { %v834_v42 = vadd.f32 %v981_v39, %v902_v37  ;;  %v984_v43 = vadd.f32 %v983_v41, %v982_v40 }
 0x336   :  { %840 = vst [vmem:[#allocation12] sm:$0xff] %v834_v42  ;;  %v837_v44 = vadd.f32 %v984_v43, %v902_v37 }
 0x338   :  { %841 = vst [vmem:[#allocation12 + $0x8] sm:$0xff] %v837_v44 }
 0x339   :  { %1215 = shalt.err (!%p1212_p2)
}
 0x33a   :  { %s1216_s29 = scalar_lea.hbm %s1423_s8, 256 }
 0x33b   :  { %p1217_p3 = scmp.ne.s32.totalorder %s1423_s8, %s1216_s29  ;;  %p1220_p4 = scmp.lt.u32.totalorder %s1216_s29, %s1423_s8 }
 0x33d   :  { %p1222_p5 = pnand %p1220_p4, %p1217_p3 }
 0x33f   :  { %1225 = shalt.err (!%p1222_p5)
}
 0x340   :  { %s1245_s10 = smov 128   ;;  %s1246_s11 = smov 8  }
 0x341   :  { %853 = dma.vmem_to_hbm [thread:$0]  %s848_s25, 256, %s1423_s8, [#allocation5], %s1245_s10, %s1245_s10, %s1246_s11  }
 0x342   :  { %1232 = dma.done.wait [#allocation5], 256  }
 0x343   :  { %1233 = vsyncadd [#allocation5], 4294967040 }
 0x344   :  { %857 = vsyncpa [#allocation4], 1 }
 0x345   :  { %858 = vsyncpa [#allocation7], 1 }
 0x346   :  { %859 = vsyncpa [#allocation10], 1 }
 0x347   :  { %860 = vsyncpa [#allocation5], 1 }

</bundles_post_ra>
